<compile_context>
chip_gen: v5e
topology: v5e:2x2
jax: 0.10.0
libtpu: 0.0.40
codegen_flags: <defaults>
</compile_context>

<pallas_src>
import jax
import jax.numpy as jnp
from jax import lax
from jax.experimental import pallas as pl
from jax.experimental.pallas import tpu as pltpu

# Module hyper-parameters (MLPPolicy.__init__): n_layers=2 hidden Tanh layers, Linear out.
OB_DIM_1 = 10     # first input feature width
OB_DIM_2 = 6      # second input feature width (concat along dim=1 -> ob_dim=16)
OB_DIM = OB_DIM_1 + OB_DIM_2
AC_DIM = 4
SIZE = 32

MATMUL_DTYPE = jnp.bfloat16   # MXU operand dtype (accumulation + elementwise stay f32)
MAX_BLOCK_B = 4096            # rows per grid step at large batch
SUB_ROWS = 512                # in-kernel sub-chunk size (bounds vreg live ranges)
MIN_PALLAS_BATCH = 16         # below this, pallas_call overhead dominates -> pure jnp
LANE_WIDTH = 128


def _round_up(x, m):
    return ((x + m - 1) // m) * m


def _build_kernel(n_sub, sub, ac_dim, lane_dense):
    """Kernel factory.

    Blocks: x1 (tb, d1) f32, x2 (tb, d2) f32, weights bf16 / biases f32 (VMEM-resident,
    constant index maps), out either (tb, ac_dim) f32 (narrow) or (tb*ac_dim//128, 128) f32
    (lane-dense, row-major-compatible packing)."""

    def kernel(x1_ref, x2_ref, w1a_ref, w1b_ref, b1_ref, w2_ref, b2_ref,
               w3_ref, b3_ref, out_ref):
        # Weights / biases are tiny and stay VMEM-resident: load once per grid step.
        w1a = w1a_ref[...]
        w1b = w1b_ref[...]
        b1 = b1_ref[...]
        w2 = w2_ref[...]
        b2 = b2_ref[...]
        w3 = w3_ref[...]
        b3 = b3_ref[...]

        def body(j, carry):
            r0 = j * sub
            if not isinstance(r0, int) and sub % 8 == 0:
                r0 = pl.multiple_of(r0, sub)

            # concat(x1, x2) @ w1 == x1 @ w1[:d1] + x2 @ w1[d1:]  (concat fused away).
            # bf16 cast happens in-register; the HBM read stays a single f32 pass.
            x1 = x1_ref[pl.ds(r0, sub), :].astype(MATMUL_DTYPE)
            x2 = x2_ref[pl.ds(r0, sub), :].astype(MATMUL_DTYPE)
            h = (jnp.dot(x1, w1a, preferred_element_type=jnp.float32)
                 + jnp.dot(x2, w1b, preferred_element_type=jnp.float32)
                 + b1)
            h = jnp.tanh(h)                                      # f32 on VPU/EUP (v5e-safe)

            h = jnp.dot(h.astype(MATMUL_DTYPE), w2,
                        preferred_element_type=jnp.float32) + b2
            h = jnp.tanh(h)

            mean = jnp.dot(h.astype(MATMUL_DTYPE), w3,
                           preferred_element_type=jnp.float32) + b3

            if lane_dense:
                # Pack 128/ac_dim batch rows per 128-lane output row: unmasked vst + dense
                # writeback DMA.  Row-major order is preserved, so the wrapper-side reshape
                # back to (B, ac_dim) is free.
                pr = sub * ac_dim // LANE_WIDTH
                o0 = j * pr
                if not isinstance(o0, int) and pr % 8 == 0:
                    o0 = pl.multiple_of(o0, pr)
                out_ref[pl.ds(o0, pr), :] = mean.reshape(pr, LANE_WIDTH)
            else:
                out_ref[pl.ds(r0, sub), :] = mean
            return carry

        if n_sub == 1:
            body(0, None)
        else:
            lax.fori_loop(0, n_sub, body, None)

    return kernel


def _mean_net_pallas(x1, x2, w1, b1, w2, b2, w3, b3):
    """mean_net(concat(x1, x2)) via a batch-tiled Pallas kernel."""
    B, d1 = x1.shape
    d2 = x2.shape[1]
    size = w1.shape[1]
    ac_dim = w3.shape[1]

    # Split the first-layer weight so the concat is fused into the kernel (two MXU pushes).
    w1a = w1[:d1, :].astype(MATMUL_DTYPE)
    w1b = w1[d1:, :].astype(MATMUL_DTYPE)
    w2m = w2.astype(MATMUL_DTYPE)
    w3m = w3.astype(MATMUL_DTYPE)
    b1f = b1.reshape(1, size).astype(jnp.float32)
    b2f = b2.reshape(1, size).astype(jnp.float32)
    b3f = b3.reshape(1, ac_dim).astype(jnp.float32)

    # Batch tile: big enough to amortize per-step overhead; >= 2 grid steps for v7x megacore
    # once B > 512; multiple of SUB_ROWS so the in-kernel sub-chunk loop divides evenly.
    if B <= SUB_ROWS:
        tb = B
    else:
        tb = min(MAX_BLOCK_B, _round_up(-(-B // 2), SUB_ROWS))
    sub = min(SUB_ROWS, tb)
    n_sub = tb // sub
    grid = (pl.cdiv(B, tb),)

    # Lane-dense packing is only representable when whole 128-lane rows hold an integer
    # number of batch rows at every boundary (array, block, sub-chunk).
    lane_dense = (
        LANE_WIDTH % ac_dim == 0
        and (B * ac_dim) % LANE_WIDTH == 0
        and (tb * ac_dim) % LANE_WIDTH == 0
        and (sub * ac_dim) % LANE_WIDTH == 0
        and (grid[0] == 1 or (tb * ac_dim // LANE_WIDTH) % 8 == 0)
    )

    # Advisory cost model (post-fusion byte counts: f32 x1/x2 reads, bf16 weights, f32 out).
    x_bytes = B * (d1 * x1.dtype.itemsize + d2 * x2.dtype.itemsize)
    w_bytes = ((d1 + d2) * size + size * size + size * ac_dim) * 2
    b_bytes = (2 * size + ac_dim) * 4
    out_bytes = B * ac_dim * 4
    cost = pl.CostEstimate(
        flops=2 * B * ((d1 + d2) * size + size * size + size * ac_dim),
        transcendentals=2 * B * size,
        bytes_accessed=x_bytes + w_bytes + b_bytes + out_bytes,
    )

    in_specs = [
        pl.BlockSpec((tb, d1), lambda i: (i, 0)),        # activations: tiled over batch
        pl.BlockSpec((tb, d2), lambda i: (i, 0)),
        pl.BlockSpec((d1, size), lambda i: (0, 0)),      # weights/biases: VMEM-resident
        pl.BlockSpec((d2, size), lambda i: (0, 0)),
        pl.BlockSpec((1, size), lambda i: (0, 0)),
        pl.BlockSpec((size, size), lambda i: (0, 0)),
        pl.BlockSpec((1, size), lambda i: (0, 0)),
        pl.BlockSpec((size, ac_dim), lambda i: (0, 0)),
        pl.BlockSpec((1, ac_dim), lambda i: (0, 0)),
    ]
    args = (x1, x2, w1a, w1b, b1f, w2m, b2f, w3m, b3f)
    cparams = pltpu.CompilerParams(
        dimension_semantics=("parallel",),               # shard the batch grid across v7x TCs
        vmem_limit_bytes=32 * 1024 * 1024,
    )

    def call(dense):
        if dense:
            out_shape = jax.ShapeDtypeStruct((B * ac_dim // LANE_WIDTH, LANE_WIDTH),
                                             jnp.float32)
            out_spec = pl.BlockSpec((tb * ac_dim // LANE_WIDTH, LANE_WIDTH),
                                    lambda i: (i, 0))
        else:
            out_shape = jax.ShapeDtypeStruct((B, ac_dim), jnp.float32)
            out_spec = pl.BlockSpec((tb, ac_dim), lambda i: (i, 0))
        out = pl.pallas_call(
            _build_kernel(n_sub, sub, ac_dim, dense),
            out_shape=out_shape,
            grid=grid,
            in_specs=in_specs,
            out_specs=out_spec,
            compiler_params=cparams,
            cost_estimate=cost,
        )(*args)
        if dense:
            out = out.reshape(B, ac_dim)   # row-major contiguous: free, no data movement
        return out

    if lane_dense:
        try:
            return call(True)
        except Exception:
            # Some Mosaic versions reject the (rows, ac_dim) -> (rows*ac_dim/128, 128)
            # in-register relayout; fall back to the correct narrow-store variant.
            pass
    return call(False)


def concat_mlp_forward(x1, x2, params):
    """ConcatMLP forward. Returns (batch_mean, batch_scale_tril)."""
    w1, b1, w2, b2, w3, b3, logstd = params
    B = x1.shape[0]
    ac_dim = w3.shape[1]

    # scale_tril = diag(exp(logstd)).repeat(B, 1, 1): batch-independent -> wrapper-side.
    scale_tril = jnp.diag(jnp.exp(logstd.astype(jnp.float32)))
    batch_scale_tril = jnp.broadcast_to(scale_tril[None, :, :], (B, ac_dim, ac_dim))

    if B < MIN_PALLAS_BATCH:
        # Tiny problem: custom-call launch + DMA-prime overhead dominates -> plain f32 jnp.
        x = jnp.concatenate([x1, x2], axis=1).astype(jnp.float32)
        h = jnp.tanh(x @ w1 + b1[None, :])
        h = jnp.tanh(h @ w2 + b2[None, :])
        mean = h @ w3 + b3[None, :]
        return mean, batch_scale_tril

    mean = _mean_net_pallas(x1, x2, w1, b1, w2, b2, w3, b3)
    return mean, batch_scale_tril


def init_params(key):
    """Deterministic parameter init mirroring build_mlp shapes (weights stored as (in, out))."""
    ks = jax.random.split(key, 6)
    scale = 0.1
    w1 = scale * jax.random.normal(ks[0], (OB_DIM, SIZE), jnp.float32)
    b1 = scale * jax.random.normal(ks[1], (SIZE,), jnp.float32)
    w2 = scale * jax.random.normal(ks[2], (SIZE, SIZE), jnp.float32)
    b2 = scale * jax.random.normal(ks[3], (SIZE,), jnp.float32)
    w3 = scale * jax.random.normal(ks[4], (SIZE, AC_DIM), jnp.float32)
    b3 = scale * jax.random.normal(ks[5], (AC_DIM,), jnp.float32)
    logstd = jnp.zeros((AC_DIM,), jnp.float32)   # nn.Parameter(torch.zeros(ac_dim))
    return (w1, b1, w2, b2, w3, b3, logstd)


def reference_forward_f32(x1, x2, params):
    """Pure-f32 JAX reference mirroring the PyTorch module's float32 math."""
    w1, b1, w2, b2, w3, b3, logstd = params
    x = jnp.concatenate([x1, x2], axis=1)
    h = jnp.tanh(x @ w1 + b1[None, :])
    h = jnp.tanh(h @ w2 + b2[None, :])
    mean = h @ w3 + b3[None, :]
    ac_dim = w3.shape[1]
    tril = jnp.broadcast_to(jnp.diag(jnp.exp(logstd))[None, :, :],
                            (x.shape[0], ac_dim, ac_dim))
    return mean, tril


def reference_forward_bf16(x1, x2, params):
    """Reference mirroring the kernel's bf16-operand / f32-accumulate matmuls."""
    w1, b1, w2, b2, w3, b3, logstd = params
    x = jnp.concatenate([x1, x2], axis=1)

    def lin(a, w, b):
        return jnp.dot(a.astype(MATMUL_DTYPE), w.astype(MATMUL_DTYPE),
                       preferred_element_type=jnp.float32) + b[None, :]

    h = jnp.tanh(lin(x, w1, b1))
    h = jnp.tanh(lin(h, w2, b2))
    mean = lin(h, w3, b3)
    ac_dim = w3.shape[1]
    tril = jnp.broadcast_to(jnp.diag(jnp.exp(logstd))[None, :, :],
                            (x.shape[0], ac_dim, ac_dim))
    return mean, tril


def _check(batch, key, params):
    k1, k2 = jax.random.split(key)
    x1 = jax.random.normal(k1, (batch, OB_DIM_1), jnp.float32)
    x2 = jax.random.normal(k2, (batch, OB_DIM_2), jnp.float32)

    mean, tril = concat_mlp_forward(x1, x2, params)
    jax.block_until_ready((mean, tril))

    ref_mean, ref_tril = reference_forward_f32(x1, x2, params)
    assert mean.shape == (batch, AC_DIM)
    assert tril.shape == (batch, AC_DIM, AC_DIM)
    # bf16 MXU operands => small (~1e-3) drift vs the pure-f32 PyTorch math.
    assert jnp.allclose(mean, ref_mean, atol=3e-2, rtol=3e-2), batch
    if batch >= MIN_PALLAS_BATCH:
        bf_mean, _ = reference_forward_bf16(x1, x2, params)
        assert jnp.allclose(mean, bf_mean, atol=5e-3, rtol=5e-3), batch
    assert jnp.allclose(tril, ref_tril, atol=1e-6, rtol=1e-6), batch


if __name__ == "__main__":
    key = jax.random.PRNGKey(0)
    k_p, k_a, k_b, k_c, k_d = jax.random.split(key, 5)
    params = init_params(k_p)

    _check(64, k_a, params)     # small batch: single grid step, lane-dense output path
    _check(8, k_b, params)      # tiny batch: jnp fallback (no pallas launch)
    _check(1000, k_c, params)   # ragged batch: grid=(2,), partial last block, narrow-store path
    _check(2048, k_d, params)   # grid=(2,) megacore split + in-kernel 512-row sub-chunk loop

    print("KERNEL_OK")
</pallas_src>

<mosaic_0001>
module attributes {stable_mosaic.version = 11 : i64} {
  func.func @kernel(%arg0: i32, %arg1: memref<64x10xf32, #tpu.memory_space<vmem>>, %arg2: memref<64x6xf32, #tpu.memory_space<vmem>>, %arg3: memref<10x32xbf16, #tpu.memory_space<vmem>>, %arg4: memref<6x32xbf16, #tpu.memory_space<vmem>>, %arg5: memref<1x32xf32, #tpu.memory_space<vmem>>, %arg6: memref<32x32xbf16, #tpu.memory_space<vmem>>, %arg7: memref<1x32xf32, #tpu.memory_space<vmem>>, %arg8: memref<32x4xbf16, #tpu.memory_space<vmem>>, %arg9: memref<1x4xf32, #tpu.memory_space<vmem>>, %arg10: memref<2x128xf32, #tpu.memory_space<vmem>>) attributes {dimension_semantics = [#tpu.dimension_semantics<parallel>], iteration_bounds = array<i64: 1>, scalar_prefetch = 0 : i64, scratch_operands = 0 : i64, tpu.core_type = #tpu.core_type<tc>, window_params = [{transform_indices = @transform_0, window_bounds = array<i64: 64, 10>}, {transform_indices = @transform_1, window_bounds = array<i64: 64, 6>}, {pipeline_mode = #tpu.pipeline_mode<synchronous>, transform_indices = @transform_2, window_bounds = array<i64: 10, 32>}, {pipeline_mode = #tpu.pipeline_mode<synchronous>, transform_indices = @transform_3, window_bounds = array<i64: 6, 32>}, {pipeline_mode = #tpu.pipeline_mode<synchronous>, transform_indices = @transform_4, window_bounds = array<i64: 1, 32>}, {pipeline_mode = #tpu.pipeline_mode<synchronous>, transform_indices = @transform_5, window_bounds = array<i64: 32, 32>}, {pipeline_mode = #tpu.pipeline_mode<synchronous>, transform_indices = @transform_6, window_bounds = array<i64: 1, 32>}, {pipeline_mode = #tpu.pipeline_mode<synchronous>, transform_indices = @transform_7, window_bounds = array<i64: 32, 4>}, {pipeline_mode = #tpu.pipeline_mode<synchronous>, transform_indices = @transform_8, window_bounds = array<i64: 1, 4>}, {transform_indices = @transform_9, window_bounds = array<i64: 2, 128>}]} {
    %c0 = arith.constant 0 : index
    %c0_0 = arith.constant 0 : index
    %0 = vector.load %arg3[%c0, %c0_0] : memref<10x32xbf16, #tpu.memory_space<vmem>>, vector<10x32xbf16>
    %c0_1 = arith.constant 0 : index
    %c0_2 = arith.constant 0 : index
    %1 = vector.load %arg4[%c0_1, %c0_2] : memref<6x32xbf16, #tpu.memory_space<vmem>>, vector<6x32xbf16>
    %c0_3 = arith.constant 0 : index
    %c0_4 = arith.constant 0 : index
    %2 = vector.load %arg5[%c0_3, %c0_4] : memref<1x32xf32, #tpu.memory_space<vmem>>, vector<1x32xf32>
    %c0_5 = arith.constant 0 : index
    %c0_6 = arith.constant 0 : index
    %3 = vector.load %arg6[%c0_5, %c0_6] : memref<32x32xbf16, #tpu.memory_space<vmem>>, vector<32x32xbf16>
    %c0_7 = arith.constant 0 : index
    %c0_8 = arith.constant 0 : index
    %4 = vector.load %arg7[%c0_7, %c0_8] : memref<1x32xf32, #tpu.memory_space<vmem>>, vector<1x32xf32>
    %c0_9 = arith.constant 0 : index
    %c0_10 = arith.constant 0 : index
    %5 = vector.load %arg8[%c0_9, %c0_10] : memref<32x4xbf16, #tpu.memory_space<vmem>>, vector<32x4xbf16>
    %c0_11 = arith.constant 0 : index
    %c0_12 = arith.constant 0 : index
    %6 = vector.load %arg9[%c0_11, %c0_12] : memref<1x4xf32, #tpu.memory_space<vmem>>, vector<1x4xf32>
    %c0_13 = arith.constant 0 : index
    %c0_14 = arith.constant 0 : index
    %7 = vector.load %arg1[%c0_13, %c0_14] : memref<64x10xf32, #tpu.memory_space<vmem>>, vector<64x10xf32>
    %8 = arith.truncf %7 : vector<64x10xf32> to vector<64x10xbf16>
    %c0_15 = arith.constant 0 : index
    %c0_16 = arith.constant 0 : index
    %9 = vector.load %arg2[%c0_15, %c0_16] : memref<64x6xf32, #tpu.memory_space<vmem>>, vector<64x6xf32>
    %10 = arith.truncf %9 : vector<64x6xf32> to vector<64x6xbf16>
    %cst = arith.constant dense<0.000000e+00> : vector<64x32xf32>
    %11 = tpu.matmul %8, %0, %cst {dimension_numbers = #tpu.dot_dimension_numbers<[1], [0], [0], [1], [0, 0, 1, 1], [], []>} : vector<64x10xbf16>, vector<10x32xbf16>, vector<64x32xf32> -> vector<64x32xf32>
    %cst_17 = arith.constant dense<0.000000e+00> : vector<64x32xf32>
    %12 = tpu.matmul %10, %1, %cst_17 {dimension_numbers = #tpu.dot_dimension_numbers<[1], [0], [0], [1], [0, 0, 1, 1], [], []>} : vector<64x6xbf16>, vector<6x32xbf16>, vector<64x32xf32> -> vector<64x32xf32>
    %13 = arith.addf %11, %12 : vector<64x32xf32>
    %14 = vector.broadcast %2 : vector<1x32xf32> to vector<64x32xf32>
    %15 = arith.addf %13, %14 : vector<64x32xf32>
    %16 = math.tanh %15 : vector<64x32xf32>
    %17 = arith.truncf %16 : vector<64x32xf32> to vector<64x32xbf16>
    %cst_18 = arith.constant dense<0.000000e+00> : vector<64x32xf32>
    %18 = tpu.matmul %17, %3, %cst_18 {dimension_numbers = #tpu.dot_dimension_numbers<[1], [0], [0], [1], [0, 0, 1, 1], [], []>} : vector<64x32xbf16>, vector<32x32xbf16>, vector<64x32xf32> -> vector<64x32xf32>
    %19 = vector.broadcast %4 : vector<1x32xf32> to vector<64x32xf32>
    %20 = arith.addf %18, %19 : vector<64x32xf32>
    %21 = math.tanh %20 : vector<64x32xf32>
    %22 = arith.truncf %21 : vector<64x32xf32> to vector<64x32xbf16>
    %cst_19 = arith.constant dense<0.000000e+00> : vector<64x4xf32>
    %23 = tpu.matmul %22, %5, %cst_19 {dimension_numbers = #tpu.dot_dimension_numbers<[1], [0], [0], [1], [0, 0, 1, 1], [], []>} : vector<64x32xbf16>, vector<32x4xbf16>, vector<64x4xf32> -> vector<64x4xf32>
    %24 = vector.broadcast %6 : vector<1x4xf32> to vector<64x4xf32>
    %25 = arith.addf %23, %24 : vector<64x4xf32>
    %26 = vector.shape_cast %25 : vector<64x4xf32> to vector<2x128xf32>
    %c0_20 = arith.constant 0 : index
    %c0_21 = arith.constant 0 : index
    %27 = vector.load %arg10[%c0_20, %c0_21] : memref<2x128xf32, #tpu.memory_space<vmem>>, vector<2x128xf32>
    tpu.vector_store %arg10[%c0_20, %c0_21], %26 {strides = array<i32>} : memref<2x128xf32, #tpu.memory_space<vmem>>, vector<2x128xf32>,
    return
  }
  func.func @transform_0(%arg0: i32) -> (i32, i32) {
    %c0_i32 = arith.constant 0 : i32
    %c0_i32_0 = arith.constant 0 : i32
    return %arg0, %c0_i32 : i32, i32
  }
  func.func @transform_1(%arg0: i32) -> (i32, i32) {
    %c0_i32 = arith.constant 0 : i32
    %c0_i32_0 = arith.constant 0 : i32
    return %arg0, %c0_i32 : i32, i32
  }
  func.func @transform_2(%arg0: i32) -> (i32, i32) {
    %c0_i32 = arith.constant 0 : i32
    %c0_i32_0 = arith.constant 0 : i32
    %c0_i32_1 = arith.constant 0 : i32
    return %c0_i32, %c0_i32_0 : i32, i32
  }
  func.func @transform_3(%arg0: i32) -> (i32, i32) {
    %c0_i32 = arith.constant 0 : i32
    %c0_i32_0 = arith.constant 0 : i32
    %c0_i32_1 = arith.constant 0 : i32
    return %c0_i32, %c0_i32_0 : i32, i32
  }
  func.func @transform_4(%arg0: i32) -> (i32, i32) {
    %c0_i32 = arith.constant 0 : i32
    %c0_i32_0 = arith.constant 0 : i32
    %c0_i32_1 = arith.constant 0 : i32
    return %c0_i32, %c0_i32_0 : i32, i32
  }
  func.func @transform_5(%arg0: i32) -> (i32, i32) {
    %c0_i32 = arith.constant 0 : i32
    %c0_i32_0 = arith.constant 0 : i32
    %c0_i32_1 = arith.constant 0 : i32
    return %c0_i32, %c0_i32_0 : i32, i32
  }
  func.func @transform_6(%arg0: i32) -> (i32, i32) {
    %c0_i32 = arith.constant 0 : i32
    %c0_i32_0 = arith.constant 0 : i32
    %c0_i32_1 = arith.constant 0 : i32
    return %c0_i32, %c0_i32_0 : i32, i32
  }
  func.func @transform_7(%arg0: i32) -> (i32, i32) {
    %c0_i32 = arith.constant 0 : i32
    %c0_i32_0 = arith.constant 0 : i32
    %c0_i32_1 = arith.constant 0 : i32
    return %c0_i32, %c0_i32_0 : i32, i32
  }
  func.func @transform_8(%arg0: i32) -> (i32, i32) {
    %c0_i32 = arith.constant 0 : i32
    %c0_i32_0 = arith.constant 0 : i32
    %c0_i32_1 = arith.constant 0 : i32
    return %c0_i32, %c0_i32_0 : i32, i32
  }
  func.func @transform_9(%arg0: i32) -> (i32, i32) {
    %c0_i32 = arith.constant 0 : i32
    %c0_i32_0 = arith.constant 0 : i32
    return %arg0, %c0_i32 : i32, i32
  }
}

module attributes {stable_mosaic.version = 11 : i64} {
  func.func @kernel(%arg0: i32, %arg1: memref<64x10xf32, #tpu.memory_space<vmem>>, %arg2: memref<64x6xf32, #tpu.memory_space<vmem>>, %arg3: memref<10x32xbf16, #tpu.memory_space<vmem>>, %arg4: memref<6x32xbf16, #tpu.memory_space<vmem>>, %arg5: memref<1x32xf32, #tpu.memory_space<vmem>>, %arg6: memref<32x32xbf16, #tpu.memory_space<vmem>>, %arg7: memref<1x32xf32, #tpu.memory_space<vmem>>, %arg8: memref<32x4xbf16, #tpu.memory_space<vmem>>, %arg9: memref<1x4xf32, #tpu.memory_space<vmem>>, %arg10: memref<64x4xf32, #tpu.memory_space<vmem>>) attributes {dimension_semantics = [#tpu.dimension_semantics<parallel>], iteration_bounds = array<i64: 1>, scalar_prefetch = 0 : i64, scratch_operands = 0 : i64, tpu.core_type = #tpu.core_type<tc>, window_params = [{transform_indices = @transform_0, window_bounds = array<i64: 64, 10>}, {transform_indices = @transform_1, window_bounds = array<i64: 64, 6>}, {pipeline_mode = #tpu.pipeline_mode<synchronous>, transform_indices = @transform_2, window_bounds = array<i64: 10, 32>}, {pipeline_mode = #tpu.pipeline_mode<synchronous>, transform_indices = @transform_3, window_bounds = array<i64: 6, 32>}, {pipeline_mode = #tpu.pipeline_mode<synchronous>, transform_indices = @transform_4, window_bounds = array<i64: 1, 32>}, {pipeline_mode = #tpu.pipeline_mode<synchronous>, transform_indices = @transform_5, window_bounds = array<i64: 32, 32>}, {pipeline_mode = #tpu.pipeline_mode<synchronous>, transform_indices = @transform_6, window_bounds = array<i64: 1, 32>}, {pipeline_mode = #tpu.pipeline_mode<synchronous>, transform_indices = @transform_7, window_bounds = array<i64: 32, 4>}, {pipeline_mode = #tpu.pipeline_mode<synchronous>, transform_indices = @transform_8, window_bounds = array<i64: 1, 4>}, {transform_indices = @transform_9, window_bounds = array<i64: 64, 4>}]} {
    %c0 = arith.constant 0 : index
    %c0_0 = arith.constant 0 : index
    %0 = vector.load %arg3[%c0, %c0_0] : memref<10x32xbf16, #tpu.memory_space<vmem>>, vector<10x32xbf16>
    %c0_1 = arith.constant 0 : index
    %c0_2 = arith.constant 0 : index
    %1 = vector.load %arg4[%c0_1, %c0_2] : memref<6x32xbf16, #tpu.memory_space<vmem>>, vector<6x32xbf16>
    %c0_3 = arith.constant 0 : index
    %c0_4 = arith.constant 0 : index
    %2 = vector.load %arg5[%c0_3, %c0_4] : memref<1x32xf32, #tpu.memory_space<vmem>>, vector<1x32xf32>
    %c0_5 = arith.constant 0 : index
    %c0_6 = arith.constant 0 : index
    %3 = vector.load %arg6[%c0_5, %c0_6] : memref<32x32xbf16, #tpu.memory_space<vmem>>, vector<32x32xbf16>
    %c0_7 = arith.constant 0 : index
    %c0_8 = arith.constant 0 : index
    %4 = vector.load %arg7[%c0_7, %c0_8] : memref<1x32xf32, #tpu.memory_space<vmem>>, vector<1x32xf32>
    %c0_9 = arith.constant 0 : index
    %c0_10 = arith.constant 0 : index
    %5 = vector.load %arg8[%c0_9, %c0_10] : memref<32x4xbf16, #tpu.memory_space<vmem>>, vector<32x4xbf16>
    %c0_11 = arith.constant 0 : index
    %c0_12 = arith.constant 0 : index
    %6 = vector.load %arg9[%c0_11, %c0_12] : memref<1x4xf32, #tpu.memory_space<vmem>>, vector<1x4xf32>
    %c0_13 = arith.constant 0 : index
    %c0_14 = arith.constant 0 : index
    %7 = vector.load %arg1[%c0_13, %c0_14] : memref<64x10xf32, #tpu.memory_space<vmem>>, vector<64x10xf32>
    %8 = arith.truncf %7 : vector<64x10xf32> to vector<64x10xbf16>
    %c0_15 = arith.constant 0 : index
    %c0_16 = arith.constant 0 : index
    %9 = vector.load %arg2[%c0_15, %c0_16] : memref<64x6xf32, #tpu.memory_space<vmem>>, vector<64x6xf32>
    %10 = arith.truncf %9 : vector<64x6xf32> to vector<64x6xbf16>
    %cst = arith.constant dense<0.000000e+00> : vector<64x32xf32>
    %11 = tpu.matmul %8, %0, %cst {dimension_numbers = #tpu.dot_dimension_numbers<[1], [0], [0], [1], [0, 0, 1, 1], [], []>} : vector<64x10xbf16>, vector<10x32xbf16>, vector<64x32xf32> -> vector<64x32xf32>
    %cst_17 = arith.constant dense<0.000000e+00> : vector<64x32xf32>
    %12 = tpu.matmul %10, %1, %cst_17 {dimension_numbers = #tpu.dot_dimension_numbers<[1], [0], [0], [1], [0, 0, 1, 1], [], []>} : vector<64x6xbf16>, vector<6x32xbf16>, vector<64x32xf32> -> vector<64x32xf32>
    %13 = arith.addf %11, %12 : vector<64x32xf32>
    %14 = vector.broadcast %2 : vector<1x32xf32> to vector<64x32xf32>
    %15 = arith.addf %13, %14 : vector<64x32xf32>
    %16 = math.tanh %15 : vector<64x32xf32>
    %17 = arith.truncf %16 : vector<64x32xf32> to vector<64x32xbf16>
    %cst_18 = arith.constant dense<0.000000e+00> : vector<64x32xf32>
    %18 = tpu.matmul %17, %3, %cst_18 {dimension_numbers = #tpu.dot_dimension_numbers<[1], [0], [0], [1], [0, 0, 1, 1], [], []>} : vector<64x32xbf16>, vector<32x32xbf16>, vector<64x32xf32> -> vector<64x32xf32>
    %19 = vector.broadcast %4 : vector<1x32xf32> to vector<64x32xf32>
    %20 = arith.addf %18, %19 : vector<64x32xf32>
    %21 = math.tanh %20 : vector<64x32xf32>
    %22 = arith.truncf %21 : vector<64x32xf32> to vector<64x32xbf16>
    %cst_19 = arith.constant dense<0.000000e+00> : vector<64x4xf32>
    %23 = tpu.matmul %22, %5, %cst_19 {dimension_numbers = #tpu.dot_dimension_numbers<[1], [0], [0], [1], [0, 0, 1, 1], [], []>} : vector<64x32xbf16>, vector<32x4xbf16>, vector<64x4xf32> -> vector<64x4xf32>
    %24 = vector.broadcast %6 : vector<1x4xf32> to vector<64x4xf32>
    %25 = arith.addf %23, %24 : vector<64x4xf32>
    %c0_20 = arith.constant 0 : index
    %c0_21 = arith.constant 0 : index
    %26 = vector.load %arg10[%c0_20, %c0_21] : memref<64x4xf32, #tpu.memory_space<vmem>>, vector<64x4xf32>
    tpu.vector_store %arg10[%c0_20, %c0_21], %25 {strides = array<i32>} : memref<64x4xf32, #tpu.memory_space<vmem>>, vector<64x4xf32>,
    return
  }
  func.func @transform_0(%arg0: i32) -> (i32, i32) {
    %c0_i32 = arith.constant 0 : i32
    %c0_i32_0 = arith.constant 0 : i32
    return %arg0, %c0_i32 : i32, i32
  }
  func.func @transform_1(%arg0: i32) -> (i32, i32) {
    %c0_i32 = arith.constant 0 : i32
    %c0_i32_0 = arith.constant 0 : i32
    return %arg0, %c0_i32 : i32, i32
  }
  func.func @transform_2(%arg0: i32) -> (i32, i32) {
    %c0_i32 = arith.constant 0 : i32
    %c0_i32_0 = arith.constant 0 : i32
    %c0_i32_1 = arith.constant 0 : i32
    return %c0_i32, %c0_i32_0 : i32, i32
  }
  func.func @transform_3(%arg0: i32) -> (i32, i32) {
    %c0_i32 = arith.constant 0 : i32
    %c0_i32_0 = arith.constant 0 : i32
    %c0_i32_1 = arith.constant 0 : i32
    return %c0_i32, %c0_i32_0 : i32, i32
  }
  func.func @transform_4(%arg0: i32) -> (i32, i32) {
    %c0_i32 = arith.constant 0 : i32
    %c0_i32_0 = arith.constant 0 : i32
    %c0_i32_1 = arith.constant 0 : i32
    return %c0_i32, %c0_i32_0 : i32, i32
  }
  func.func @transform_5(%arg0: i32) -> (i32, i32) {
    %c0_i32 = arith.constant 0 : i32
    %c0_i32_0 = arith.constant 0 : i32
    %c0_i32_1 = arith.constant 0 : i32
    return %c0_i32, %c0_i32_0 : i32, i32
  }
  func.func @transform_6(%arg0: i32) -> (i32, i32) {
    %c0_i32 = arith.constant 0 : i32
    %c0_i32_0 = arith.constant 0 : i32
    %c0_i32_1 = arith.constant 0 : i32
    return %c0_i32, %c0_i32_0 : i32, i32
  }
  func.func @transform_7(%arg0: i32) -> (i32, i32) {
    %c0_i32 = arith.constant 0 : i32
    %c0_i32_0 = arith.constant 0 : i32
    %c0_i32_1 = arith.constant 0 : i32
    return %c0_i32, %c0_i32_0 : i32, i32
  }
  func.func @transform_8(%arg0: i32) -> (i32, i32) {
    %c0_i32 = arith.constant 0 : i32
    %c0_i32_0 = arith.constant 0 : i32
    %c0_i32_1 = arith.constant 0 : i32
    return %c0_i32, %c0_i32_0 : i32, i32
  }
  func.func @transform_9(%arg0: i32) -> (i32, i32) {
    %c0_i32 = arith.constant 0 : i32
    %c0_i32_0 = arith.constant 0 : i32
    return %arg0, %c0_i32 : i32, i32
  }
}

</mosaic_0001>

<bundles_post_ra>
// kernel: tpu_custom_call.1
= control target key start
LH: loop header
LB: loop body
LE: loop exit
PB: predicated region body
PF: predicated region fallthrough
CT: control target
= control target key end

     0   :  { %vm84_vm0 = vcmask 1042432   ;;  %vm135_vm1 = vcmask 1044480   ;;  %vm71_vm2 = vcmask 48128   ;;  %vm122_vm3 = vcmask 80896   ;;  %s581_s3 = inlined_call_operand.vmem [shape: bf16[6,32], index: 3, kind: input, shape index: {}]   ;;  %s582_s2 = inlined_call_operand.vmem [shape: bf16[10,32], index: 2, kind: input, shape index: {}]   ;;  %s583_s1 = inlined_call_operand.vmem [shape: f32[64,6], index: 1, kind: input, shape index: {}]   ;;  %s584_s0 = inlined_call_operand.vmem [shape: f32[64,10], index: 0, kind: input, shape index: {}]   ;;  %s585_s4 = inlined_call_operand.vmem [shape: f32[1,32], index: 4, kind: input, shape index: {}]   ;;  %s586_s6 = inlined_call_operand.vmem [shape: f32[1,32], index: 6, kind: input, shape index: {}]   ;;  %s587_s5 = inlined_call_operand.vmem [shape: bf16[32,32], index: 5, kind: input, shape index: {}]   ;;  %s588_s8 = inlined_call_operand.vmem [shape: f32[1,4], index: 8, kind: input, shape index: {}]   ;;  %s589_s7 = inlined_call_operand.vmem [shape: bf16[32,4], index: 7, kind: input, shape index: {}]   ;;  %s590_s9 = inlined_call_operand.vmem [shape: f32[64,4], index: 9, kind: output, shape index: {}]  }
   0x1   :  { %v35_v0 = vld [vmem:[%s581_s3] sm:$0x7]  ;;  %v365_v2 = vld [vmem:[%s582_s2] sm:$0x10]  ;;  %v60_v6 = vld [vmem:[%s583_s1 + $0x8] sm:$0xff]  ;;  %vm206_vm4 = vcmask 261120  }
   0x2   :  { %v335_v1 = vld [vmem:[%s582_s2] sm:$0xf]  ;;  %v86_v3 = vsel %vm84_vm0, %v35_v0, 0  ;;  %v48_v9 = vld [vmem:[%s584_s0 + $0x8] sm:$0xff]  ;;  %v61_v12 = vld [vmem:[%s583_s1 + $0x10] sm:$0xff]  ;;  %vm316_vm5 = vcmask 31744  }
   0x3   :  { %v336_v4 = vor.u32 %v365_v2, %v335_v1  ;;  %v59_v5 = vld [vmem:[%s583_s1] sm:$0xff]  ;;  %95 = vmatpush.bf16.msra.mxu0 %v86_v3  ;;  %v62_v13 = vld [vmem:[%s583_s1 + $0x18] sm:$0xff]  ;;  %v49_v14 = vld [vmem:[%s584_s0 + $0x10] sm:$0xff] }
   0x4   :  { %v47_v7 = vld [vmem:[%s584_s0] sm:$0xff]  ;;  %v67_v8 = vpack.c.bf16 %v60_v6, %v59_v5  ;;  %v50_v15 = vld [vmem:[%s584_s0 + $0x18] sm:$0xff]  ;;  %v68_v16 = vpack.c.bf16 %v62_v13, %v61_v12  ;;  %v64_v19 = vld [vmem:[%s583_s1 + $0x28] sm:$0xff] }
   0x5   :  { %v137_v10 = vsel %vm135_vm1, %v336_v4, 0  ;;  %v55_v11 = vpack.c.bf16 %v48_v9, %v47_v7  ;;  %v56_v17 = vpack.c.bf16 %v50_v15, %v49_v14  ;;  %v63_v18 = vld [vmem:[%s583_s1 + $0x20] sm:$0xff]  ;;  %v52_v21 = vld [vmem:[%s584_s0 + $0x28] sm:$0xff]  ;;  %v65_v24 = vld [vmem:[%s583_s1 + $0x30] sm:$0xff] }
   0x6   :  { %146 = vmatpush.bf16.msra.mxu1 %v137_v10  ;;  %329 = vmatmul.msk.bf16.vlgmr.msra.gmra.mxu0 %vm71_vm2, %v67_v8  ;;  %v51_v20 = vld [vmem:[%s584_s0 + $0x20] sm:$0xff]  ;;  %v69_v22 = vpack.c.bf16 %v64_v19, %v63_v18  ;;  %v66_v25 = vld [vmem:[%s583_s1 + $0x38] sm:$0xff]  ;;  %v53_v26 = vld [vmem:[%s584_s0 + $0x30] sm:$0xff] }
   0x7   :  { %v57_v23 = vpack.c.bf16 %v52_v21, %v51_v20  ;;  %v54_v27 = vld [vmem:[%s584_s0 + $0x38] sm:$0xff]  ;;  %v70_v28 = vpack.c.bf16 %v66_v25, %v65_v24  ;;  %v367_v30 = vld [vmem:[%s587_s5 + $0x8] sm:$0xff]  ;;  %v366_v31 = vld [vmem:[%s587_s5] sm:$0xff] }
   0x8   :  { %v58_v29 = vpack.c.bf16 %v54_v27, %v53_v26  ;;  %225 = vmatpush.bf16.msra.mxu2 %v367_v30  ;;  %v370_v35 = vld [vmem:[%s585_s4] ss:$0 sm:$0xff]  ;;  %v369_v13 = vld [vmem:[%s589_s7 + $0x8] sm:$0xff] }
   0x9   :  { %337 = vmatmul.msk.bf16.vlgmr.msra.gmra.mxu1 %vm122_vm3, %v55_v11  ;;  %293 = vmatpush.bf16.msra.mxu3 %v369_v13  ;;  %v368_v14 = vld [vmem:[%s589_s7] sm:$0xff] }
   0xc   :  { %226 = vmatpush.bf16.msra.mxu2 %v366_v31 }
   0xd   :  { %294 = vmatpush.bf16.msra.mxu3 %v368_v14 }
  0x16   :  { %330 = vmatmul.msk.bf16.gmra.mxu0 %vm71_vm2, %v68_v16  ;;  %v371_v16 = vld [vmem:[%s586_s6] ss:$0 sm:$0xff] }
  0x19   :  { %338 = vmatmul.msk.bf16.gmra.mxu1 %vm122_vm3, %v56_v17 }
  0x26   :  { %331 = vmatmul.msk.bf16.gmra.mxu0 %vm71_vm2, %v69_v22 }
  0x29   :  { %339 = vmatmul.msk.bf16.gmra.mxu1 %vm122_vm3, %v57_v23 }
  0x36   :  { %332 = vmatmul.msk.bf16.gmra.mxu0 %vm71_vm2, %v70_v28 }
  0x39   :  { %340 = vmatmul.msk.bf16.gmra.mxu1 %vm122_vm3, %v58_v29 }
  0x83   :  { %v97_v32 = vpop.f32.mrf.mxu0 }
  0x86   :  { %v148_v33 = vpop.f32.mrf.mxu1 }
  0x87   :  { %v149_v34 = vadd.f32 %v148_v33, %v97_v32 }
  0x89   :  { %v171_v37 = vadd.f32 %v370_v35, %v149_v34 }
  0x8b   :  { %v99_v36 = vpop.f32.mrf.mxu0  ;;  %373 = vtanh.f32 %v171_v37 }
  0x8e   :  { %v150_v38 = vpop.f32.mrf.mxu1 }
  0x8f   :  { %v151_v39 = vadd.f32 %v150_v38, %v99_v36 }
  0x91   :  { %v172_v40 = vadd.f32 %v370_v35, %v151_v39  ;;  %v374_v43 = vpop.eup %373 }
  0x93   :  { %375 = vtanh.f32 %v172_v40  ;;  %v102_v41 = vpop.f32.mrf.mxu0 }
  0x96   :  { %v153_v42 = vpop.f32.mrf.mxu1 }
  0x97   :  { %v154_v45 = vadd.f32 %v153_v42, %v102_v41 }
  0x99   :  { %v376_v44 = vpop.eup %375  ;;  %v173_v48 = vadd.f32 %v370_v35, %v154_v45 }
  0x9a   :  { %v187_v46 = vpack.c.bf16 %v376_v44, %v374_v43  ;;  %v372_v44 = vld [vmem:[%s588_s8] ss:$0 sm:$0xff] }
  0x9b   :  { %v104_v47 = vpop.f32.mrf.mxu0  ;;  %377 = vtanh.f32 %v173_v48 }
  0x9c   :  { %349 = vmatmul.msk.bf16.vlgmr.msra.gmra.mxu2 %vm206_vm4, %v187_v46 }
  0x9e   :  { %v155_v49 = vpop.f32.mrf.mxu1 }
  0x9f   :  { %v156_v50 = vadd.f32 %v155_v49, %v104_v47 }
  0xa1   :  { %v174_v51 = vadd.f32 %v370_v35, %v156_v50  ;;  %v378_v54 = vpop.eup %377 }
  0xa3   :  { %379 = vtanh.f32 %v174_v51  ;;  %v107_v52 = vpop.f32.mrf.mxu0 }
  0xa6   :  { %v158_v53 = vpop.f32.mrf.mxu1 }
  0xa7   :  { %v159_v56 = vadd.f32 %v158_v53, %v107_v52 }
  0xa9   :  { %v380_v55 = vpop.eup %379  ;;  %v175_v59 = vadd.f32 %v370_v35, %v159_v56 }
  0xaa   :  { %v188_v57 = vpack.c.bf16 %v380_v55, %v378_v54 }
  0xab   :  { %v109_v58 = vpop.f32.mrf.mxu0  ;;  %381 = vtanh.f32 %v175_v59 }
  0xac   :  { %350 = vmatmul.msk.bf16.gmra.mxu2 %vm206_vm4, %v188_v57 }
  0xae   :  { %v160_v60 = vpop.f32.mrf.mxu1 }
  0xaf   :  { %v161_v61 = vadd.f32 %v160_v60, %v109_v58 }
  0xb1   :  { %v176_v62 = vadd.f32 %v370_v35, %v161_v61  ;;  %v382_v1 = vpop.eup %381 }
  0xb3   :  { %383 = vtanh.f32 %v176_v62  ;;  %v112_v63 = vpop.f32.mrf.mxu0 }
  0xb6   :  { %v163_v0 = vpop.f32.mrf.mxu1 }
  0xb7   :  { %v164_v3 = vadd.f32 %v163_v0, %v112_v63 }
  0xb9   :  { %v384_v2 = vpop.eup %383  ;;  %v177_v5 = vadd.f32 %v370_v35, %v164_v3 }
  0xba   :  { %v189_v4 = vpack.c.bf16 %v384_v2, %v382_v1 }
  0xbb   :  { %v114_v6 = vpop.f32.mrf.mxu0  ;;  %385 = vtanh.f32 %v177_v5 }
  0xbc   :  { %351 = vmatmul.msk.bf16.gmra.mxu2 %vm206_vm4, %v189_v4 }
  0xbe   :  { %v165_v7 = vpop.f32.mrf.mxu1 }
  0xbf   :  { %v166_v8 = vadd.f32 %v165_v7, %v114_v6 }
  0xc1   :  { %v178_v9 = vadd.f32 %v370_v35, %v166_v8  ;;  %v386_v10 = vpop.eup %385 }
  0xc3   :  { %387 = vtanh.f32 %v178_v9 }
  0xc9   :  { %v388_v11 = vpop.eup %387 }
  0xca   :  { %v190_v12 = vpack.c.bf16 %v388_v11, %v386_v10 }
  0xcc   :  { %352 = vmatmul.msk.bf16.gmra.mxu2 %vm206_vm4, %v190_v12 }
 0x11f   :  { %v228_v15 = vpop.f32.mrf.mxu2 }
 0x120   :  { %v229_v17 = vadd.f32 %v371_v16, %v228_v15 }
 0x122   :  { %389 = vtanh.f32 %v229_v17 }
 0x127   :  { %v230_v18 = vpop.f32.mrf.mxu2 }
 0x128   :  { %v231_v19 = vadd.f32 %v371_v16, %v230_v18  ;;  %v390_v20 = vpop.eup %389 }
 0x12a   :  { %391 = vtanh.f32 %v231_v19 }
 0x12f   :  { %v233_v21 = vpop.f32.mrf.mxu2 }
 0x130   :  { %v392_v22 = vpop.eup %391  ;;  %v234_v24 = vadd.f32 %v371_v16, %v233_v21 }
 0x131   :  { %v256_v23 = vpack.c.bf16 %v392_v22, %v390_v20 }
 0x132   :  { %393 = vtanh.f32 %v234_v24 }
 0x133   :  { %361 = vmatmul.msk.bf16.vlgmr.msra.gmra.mxu3 %vm206_vm4, %v256_v23 }
 0x137   :  { %v235_v25 = vpop.f32.mrf.mxu2 }
 0x138   :  { %v236_v26 = vadd.f32 %v371_v16, %v235_v25  ;;  %v394_v27 = vpop.eup %393 }
 0x13a   :  { %395 = vtanh.f32 %v236_v26 }
 0x13f   :  { %v238_v28 = vpop.f32.mrf.mxu2 }
 0x140   :  { %v396_v29 = vpop.eup %395  ;;  %v239_v31 = vadd.f32 %v371_v16, %v238_v28 }
 0x141   :  { %v257_v30 = vpack.c.bf16 %v396_v29, %v394_v27 }
 0x142   :  { %397 = vtanh.f32 %v239_v31 }
 0x143   :  { %362 = vmatmul.msk.bf16.gmra.mxu3 %vm206_vm4, %v257_v30 }
 0x147   :  { %v240_v32 = vpop.f32.mrf.mxu2 }
 0x148   :  { %v241_v33 = vadd.f32 %v371_v16, %v240_v32  ;;  %v398_v34 = vpop.eup %397 }
 0x14a   :  { %399 = vtanh.f32 %v241_v33 }
 0x14f   :  { %v243_v35 = vpop.f32.mrf.mxu2 }
 0x150   :  { %v400_v36 = vpop.eup %399  ;;  %v244_v38 = vadd.f32 %v371_v16, %v243_v35 }
 0x151   :  { %v258_v37 = vpack.c.bf16 %v400_v36, %v398_v34 }
 0x152   :  { %401 = vtanh.f32 %v244_v38 }
 0x153   :  { %363 = vmatmul.msk.bf16.gmra.mxu3 %vm206_vm4, %v258_v37 }
 0x157   :  { %v245_v39 = vpop.f32.mrf.mxu2 }
 0x158   :  { %v246_v40 = vadd.f32 %v371_v16, %v245_v39  ;;  %v402_v41 = vpop.eup %401 }
 0x15a   :  { %403 = vtanh.f32 %v246_v40 }
 0x160   :  { %v404_v42 = vpop.eup %403 }
 0x161   :  { %v259_v43 = vpack.c.bf16 %v404_v42, %v402_v41 }
 0x163   :  { %364 = vmatmul.msk.bf16.gmra.mxu3 %vm206_vm4, %v259_v43 }
 0x1b6   :  { %v296_v45 = vpop.f32.mrf.mxu3 }
 0x1b7   :  { %v297_v46 = vadd.f32 %v372_v44, %v296_v45 }
 0x1b9   :  { %317 = vst.msk [vmem:[%s590_s9] sm:$0xff] %vm316_vm5, %v297_v46 }
 0x1be   :  { %v298_v47 = vpop.f32.mrf.mxu3 }
 0x1bf   :  { %v299_v48 = vadd.f32 %v372_v44, %v298_v47 }
 0x1c1   :  { %318 = vst.msk [vmem:[%s590_s9 + $0x8] sm:$0xff] %vm316_vm5, %v299_v48 }
 0x1c6   :  { %v301_v49 = vpop.f32.mrf.mxu3 }
 0x1c7   :  { %v302_v50 = vadd.f32 %v372_v44, %v301_v49 }
 0x1c9   :  { %319 = vst.msk [vmem:[%s590_s9 + $0x10] sm:$0xff] %vm316_vm5, %v302_v50 }
 0x1ce   :  { %v303_v51 = vpop.f32.mrf.mxu3 }
 0x1cf   :  { %v304_v52 = vadd.f32 %v372_v44, %v303_v51 }
 0x1d1   :  { %320 = vst.msk [vmem:[%s590_s9 + $0x18] sm:$0xff] %vm316_vm5, %v304_v52 }
 0x1d6   :  { %v306_v53 = vpop.f32.mrf.mxu3 }
 0x1d7   :  { %v307_v54 = vadd.f32 %v372_v44, %v306_v53 }
 0x1d9   :  { %321 = vst.msk [vmem:[%s590_s9 + $0x20] sm:$0xff] %vm316_vm5, %v307_v54 }
 0x1de   :  { %v308_v55 = vpop.f32.mrf.mxu3 }
 0x1df   :  { %v309_v56 = vadd.f32 %v372_v44, %v308_v55 }
 0x1e1   :  { %322 = vst.msk [vmem:[%s590_s9 + $0x28] sm:$0xff] %vm316_vm5, %v309_v56 }
 0x1e6   :  { %v311_v57 = vpop.f32.mrf.mxu3 }
 0x1e7   :  { %v312_v58 = vadd.f32 %v372_v44, %v311_v57 }
 0x1e9   :  { %323 = vst.msk [vmem:[%s590_s9 + $0x30] sm:$0xff] %vm316_vm5, %v312_v58 }
 0x1ee   :  { %v313_v59 = vpop.f32.mrf.mxu3 }
 0x1ef   :  { %v314_v60 = vadd.f32 %v372_v44, %v313_v59 }
 0x1f1   :  { %324 = vst.msk [vmem:[%s590_s9 + $0x38] sm:$0xff] %vm316_vm5, %v314_v60 }

</bundles_post_ra>
